<compile_context>
chip_gen: v6e
topology: v6e:2x2x1
jax: 0.10.0
libtpu: 0.0.40
codegen_flags: <defaults>
</compile_context>

<pallas_src>
import functools

import jax
import jax.numpy as jnp
from jax.experimental import pallas as pl
from jax.experimental.pallas import tpu as pltpu


def _round_up(x, m):
    return ((x + m - 1) // m) * m


def _cdiv(a, b):
    return (a + b - 1) // b


_TK_CAP = 2048                        # feature (reduction) tile cap, mult of 128
_TM_CAP = 256                         # batch tile cap, mult of 8
_RESIDENT_W_BUDGET = 24 * 1024 * 1024  # bytes allowed for the resident weight (x2 buf)


def _feature_tiling(F):
    """Waste-minimizing reduction tiling: nk tiles of size tk (multiple of 128)."""
    F = max(int(F), 1)
    nk = max(1, _cdiv(F, _TK_CAP))
    tk = _round_up(_cdiv(F, nk), 128)
    return tk, nk, nk * tk            # (tk, nk, F_pad)


def _batch_tiling(B):
    """Waste-minimizing batch tiling (multiple of 8); force >=2 tiles when B is
    big enough so the 'parallel' grid axis can shard across two TensorCores."""
    B = max(int(B), 1)
    nb = max(1, _cdiv(B, _TM_CAP))
    tm = _round_up(_cdiv(B, nb), 8)
    if nb == 1 and B > 8:             # v7x megacore: split batch across 2 TCs
        tm = _round_up(_cdiv(B, 2), 8)
    nb = _cdiv(B, tm)
    return tm, nb, nb * tm            # (tm, nb, B_pad)


# ----------------------------- kernels ---------------------------------------

def _linear_single_kernel(x_ref, w_ref, o_ref):
    # x: (tm, F_pad)  w: (F_pad, N_pad)  o: (tm, N_pad) — one matmul, one store.
    o_ref[...] = jnp.dot(x_ref[...], w_ref[...],
                         preferred_element_type=jnp.float32)


def _linear_resident_kernel(x_ref, w_ref, o_ref, *, tk):
    # Weight fully resident in VMEM (constant block index -> fetched once);
    # slice the active K-chunk in-kernel. Accumulate directly into o_ref (f32,
    # resident across the reduction axis).
    k = pl.program_id(1)

    @pl.when(k == 0)
    def _():
        o_ref[...] = jnp.zeros_like(o_ref)

    start = pl.multiple_of(k * tk, tk)
    o_ref[...] += jnp.dot(x_ref[...], w_ref[pl.ds(start, tk), :],
                          preferred_element_type=jnp.float32)


def _linear_stream_kernel(x_ref, w_ref, o_ref):
    # Fallback when the padded weight is too large to hold resident in VMEM.
    k = pl.program_id(1)

    @pl.when(k == 0)
    def _():
        o_ref[...] = jnp.zeros_like(o_ref)

    o_ref[...] += jnp.dot(x_ref[...], w_ref[...],
                          preferred_element_type=jnp.float32)


# ----------------------------- host-side API ----------------------------------

def prepare_params(weight, bias):
    """One-time (init-time) prep: transpose torch-layout (n_tasks, F) weight to
    (F, n_tasks) and zero-pad to (F_pad, N_pad) so the kernel's output block is
    lane-dense (unmasked vst). Kept out of the per-call hot path."""
    n_tasks, F = weight.shape
    _, _, F_pad = _feature_tiling(F)
    N_pad = _round_up(max(n_tasks, 1), 128)
    w_padded = jnp.zeros((F_pad, N_pad), jnp.float32).at[:F, :n_tasks].set(
        jnp.asarray(weight, jnp.float32).T)
    return w_padded, jnp.asarray(bias, jnp.float32)


@functools.partial(jax.jit, static_argnames=("n_tasks",))
def mock_scalar_model_forward(x, w_padded, bias, *, n_tasks):
    """x: (B, A, L) float32; w_padded: (F_pad, N_pad) from prepare_params;
    bias: (n_tasks,) float32."""
    B = x.shape[0]
    F = 1
    for d in x.shape[1:]:
        F *= int(d)
    x_flat = x.reshape(B, F)                         # flatten(start_dim=1)

    tm, nb, B_pad = _batch_tiling(B)
    tk, nk, F_pad = _feature_tiling(F)
    N_pad = w_padded.shape[1]
    assert w_padded.shape[0] == F_pad, (w_padded.shape, F_pad)

    # Pad only when needed; under jit this fuses (no extra HBM round trip).
    if B_pad != B or F_pad != F:
        x_in = jnp.pad(x_flat, ((0, B_pad - B), (0, F_pad - F)))
    else:
        x_in = x_flat

    itemsize = 4
    out_bytes = 2 * tm * N_pad * itemsize

    if nk == 1:
        # Single-shot path: no reduction axis, no accumulator, no pl.when.
        grid = (nb,)
        in_specs = [pl.BlockSpec((tm, F_pad), lambda i: (i, 0)),
                    pl.BlockSpec((F_pad, N_pad), lambda i: (0, 0))]
        out_specs = pl.BlockSpec((tm, N_pad), lambda i: (i, 0))
        kernel = _linear_single_kernel
        semantics = ("parallel",)
        est = (2 * tm * F_pad + 2 * F_pad * N_pad) * itemsize + out_bytes
    else:
        w_alloc = 2 * F_pad * N_pad * itemsize
        if w_alloc <= _RESIDENT_W_BUDGET:
            # Resident weight: fetched once, never re-streamed per batch tile.
            in_specs = [pl.BlockSpec((tm, tk), lambda i, k: (i, k)),
                        pl.BlockSpec((F_pad, N_pad), lambda i, k: (0, 0))]
            kernel = functools.partial(_linear_resident_kernel, tk=tk)
            est = 2 * tm * tk * itemsize + w_alloc + out_bytes
        else:
            # Streaming fallback for very large weights.
            in_specs = [pl.BlockSpec((tm, tk), lambda i, k: (i, k)),
                        pl.BlockSpec((tk, N_pad), lambda i, k: (k, 0))]
            kernel = _linear_stream_kernel
            est = (2 * tm * tk + 2 * tk * N_pad) * itemsize + out_bytes
        grid = (nb, nk)
        out_specs = pl.BlockSpec((tm, N_pad), lambda i, k: (i, 0))
        semantics = ("parallel", "arbitrary")

    # Enough for the footprint, capped to keep headroom on v7x (64 MiB VMEM/TC).
    vmem_limit = int(min(48 << 20, max(32 << 20, est + (8 << 20))))

    out_p = pl.pallas_call(
        kernel,
        out_shape=jax.ShapeDtypeStruct((B_pad, N_pad), jnp.float32),
        grid_spec=pltpu.PrefetchScalarGridSpec(
            num_scalar_prefetch=0,
            grid=grid,
            in_specs=in_specs,
            out_specs=out_specs,
        ),
        compiler_params=pltpu.CompilerParams(
            dimension_semantics=semantics,
            vmem_limit_bytes=vmem_limit,
        ),
    )(x_in, w_padded)

    # Bias + un-pad epilogue on the tiny (B, n_tasks) slice; fuses under jit.
    out = out_p[:B, :n_tasks] + bias.reshape(1, n_tasks)
    if n_tasks > 1:
        return out.reshape(-1, n_tasks)
    return out.reshape(-1)


def init_params(key, A, L, n_tasks):
    """Deterministic init mimicking torch.nn.Linear default (U(+/- 1/sqrt(fan_in)))."""
    in_features = A * L
    k_w, k_b = jax.random.split(key)
    bound = 1.0 / jnp.sqrt(jnp.float32(in_features))
    weight = jax.random.uniform(k_w, (n_tasks, in_features), jnp.float32,
                                minval=-bound, maxval=bound)
    bias = jax.random.uniform(k_b, (n_tasks,), jnp.float32,
                              minval=-bound, maxval=bound)
    return weight, bias


if __name__ == "__main__":
    # MockScalarModel shapes: x (B, A, L), Linear(A*L -> n_tasks).
    B, A, L, n_tasks = 2, 4, 16, 1
    key = jax.random.PRNGKey(0)
    k_x, k_p, k_p2, k_x3, k_p3 = jax.random.split(key, 5)

    x = jax.random.normal(k_x, (B, A, L), jnp.float32)
    weight, bias = init_params(k_p, A, L, n_tasks)
    w_padded, bias_f32 = prepare_params(weight, bias)

    out = jax.block_until_ready(
        mock_scalar_model_forward(x, w_padded, bias_f32, n_tasks=n_tasks))
    ref = (x.reshape(B, A * L) @ weight.T + bias).reshape(-1)
    assert out.shape == (B,), out.shape
    assert jnp.allclose(out, ref, atol=1e-5, rtol=1e-5), (out, ref)

    # Multi-task branch (n_tasks > 1), still the single-shot fast path.
    n_tasks2 = 3
    w2, b2 = init_params(k_p2, A, L, n_tasks2)
    w2_p, b2_f = prepare_params(w2, b2)
    out2 = jax.block_until_ready(
        mock_scalar_model_forward(x, w2_p, b2_f, n_tasks=n_tasks2))
    ref2 = x.reshape(B, A * L) @ w2.T + b2
    assert out2.shape == (B, n_tasks2), out2.shape
    assert jnp.allclose(out2, ref2, atol=1e-5, rtol=1e-5)

    # Larger feature axis to exercise the resident-weight reduction path.
    B3, A3, L3, n_tasks3 = 16, 8, 320, 2          # F = 2560 -> 2 reduction tiles
    x3 = jax.random.normal(k_x3, (B3, A3, L3), jnp.float32)
    w3, b3 = init_params(k_p3, A3, L3, n_tasks3)
    w3_p, b3_f = prepare_params(w3, b3)
    out3 = jax.block_until_ready(
        mock_scalar_model_forward(x3, w3_p, b3_f, n_tasks=n_tasks3))
    ref3 = x3.reshape(B3, A3 * L3) @ w3.T + b3
    assert out3.shape == (B3, n_tasks3), out3.shape
    assert jnp.allclose(out3, ref3, atol=1e-3, rtol=1e-3)

    print("KERNEL_OK")
</pallas_src>

<mosaic_0001>
module attributes {stable_mosaic.version = 11 : i64} {
  func.func @_linear_single_kernel(%arg0: i32, %arg1: memref<8x128xf32, #tpu.memory_space<vmem>>, %arg2: memref<128x128xf32, #tpu.memory_space<vmem>>, %arg3: memref<8x128xf32, #tpu.memory_space<vmem>>) attributes {dimension_semantics = [#tpu.dimension_semantics<parallel>], iteration_bounds = array<i64: 1>, scalar_prefetch = 0 : i64, scratch_operands = 0 : i64, tpu.core_type = #tpu.core_type<tc>, window_params = [{transform_indices = @transform_0, window_bounds = array<i64: 8, 128>}, {pipeline_mode = #tpu.pipeline_mode<synchronous>, transform_indices = @transform_1, window_bounds = array<i64: 128, 128>}, {transform_indices = @transform_2, window_bounds = array<i64: 8, 128>}]} {
    %c0 = arith.constant 0 : index
    %c0_0 = arith.constant 0 : index
    %0 = vector.load %arg1[%c0, %c0_0] : memref<8x128xf32, #tpu.memory_space<vmem>>, vector<8x128xf32>
    %c0_1 = arith.constant 0 : index
    %c0_2 = arith.constant 0 : index
    %1 = vector.load %arg2[%c0_1, %c0_2] : memref<128x128xf32, #tpu.memory_space<vmem>>, vector<128x128xf32>
    %cst = arith.constant dense<0.000000e+00> : vector<8x128xf32>
    %2 = tpu.matmul %0, %1, %cst {dimension_numbers = #tpu.dot_dimension_numbers<[1], [0], [0], [1], [0, 0, 1, 1], [], []>} : vector<8x128xf32>, vector<128x128xf32>, vector<8x128xf32> -> vector<8x128xf32>
    %c0_3 = arith.constant 0 : index
    %c0_4 = arith.constant 0 : index
    %3 = vector.load %arg3[%c0_3, %c0_4] : memref<8x128xf32, #tpu.memory_space<vmem>>, vector<8x128xf32>
    tpu.vector_store %arg3[%c0_3, %c0_4], %2 {strides = array<i32>} : memref<8x128xf32, #tpu.memory_space<vmem>>, vector<8x128xf32>,
    return
  }
  func.func @transform_0(%arg0: i32) -> (i32, i32) {
    %c0_i32 = arith.constant 0 : i32
    %c0_i32_0 = arith.constant 0 : i32
    return %arg0, %c0_i32 : i32, i32
  }
  func.func @transform_1(%arg0: i32) -> (i32, i32) {
    %c0_i32 = arith.constant 0 : i32
    %c0_i32_0 = arith.constant 0 : i32
    %c0_i32_1 = arith.constant 0 : i32
    return %c0_i32, %c0_i32_0 : i32, i32
  }
  func.func @transform_2(%arg0: i32) -> (i32, i32) {
    %c0_i32 = arith.constant 0 : i32
    %c0_i32_0 = arith.constant 0 : i32
    return %arg0, %c0_i32 : i32, i32
  }
}

</mosaic_0001>

<bundles_post_ra>
// kernel: mock_scalar_model_forward.1
= control target key start
LH: loop header
LB: loop body
LE: loop exit
PB: predicated region body
PF: predicated region fallthrough
CT: control target
= control target key end

     0   :  { %7 = vsyncpa [#allocation3], 0  ;;  %s197_s9 = smov [#allocation2]   ;;  %s226_s0 = inlined_call_operand.vmem [shape: f32[8,128], index: 0, kind: input, shape index: {}]   ;;  %s227_s1 = inlined_call_operand.hbm [shape: f32[128,128], index: 1, kind: input, shape index: {}]   ;;  %s228_s2 = inlined_call_operand.vmem [shape: f32[8,128], index: 2, kind: output, shape index: {}]  }
   0x1   :  { %s15_s10 = sshll.u32 %s197_s9, 4  ;;  %s16_s10 = int_to_ptr.vmem [resolvable:$true] %s15_s10 }
   0x2   :  { %s183_s11 = scalar_lea.vmem %s16_s10, 2048  ;;  %p188_p1 = scmp.lt.s32.totalorder %s16_s10, %s16_s10 }
   0x3   :  { %p184_p0 = scmp.ne.s32.totalorder %s16_s10, %s183_s11  ;;  %p189_p2 = scmp.lt.s32.totalorder %s183_s11, %s183_s11 }
   0x5   :  { %p190_p3 = por %p189_p2, %p188_p1 }
   0x7   :  { %p191_p4 = pnand %p190_p3, %p184_p0 }
   0x9   :  { %194 = shalt.err (!%p191_p4)
}
   0xa   :  { %s198_s12 = smov 128   ;;  %s199_s13 = smov 8  }
   0xb   :  { %21 = dma.hbm_to_vmem [thread:$0]  %s227_s1, 2048, %s16_s10, [#allocation3], %s198_s12, %s198_s12, %s199_s13  }
   0xc   :  { %195 = dma.done.wait [#allocation3], 2048  }
   0xd   :  { %196 = vsyncadd [#allocation3], 4294965248  ;;  %v200_v0 = vmov 0.0   ;;  %vm201_vm0 = vmmov 0   ;;  %v41_v1 = vld [vmem:[#allocation2 + $0x78] sm:$0xff]  ;;  %v40_v2 = vld [vmem:[#allocation2 + $0x70] sm:$0xff] }
   0xe   :  { %135 = vmatprep.subr.mxu0 %v200_v0  ;;  %167 = vmatprep.mubr.msk.f32.mxu0 %vm201_vm0, %v200_v0  ;;  %v39_v3 = vld [vmem:[#allocation2 + $0x68] sm:$0xff]  ;;  %v38_v4 = vld [vmem:[#allocation2 + $0x60] sm:$0xff]  ;;  %v37_v5 = vld [vmem:[#allocation2 + $0x58] sm:$0xff] }
   0xf   :  { %136 = vmatpush3.msra.mxu0 %v41_v1  ;;  %v36_v6 = vld [vmem:[#allocation2 + $0x50] sm:$0xff]  ;;  %v35_v7 = vld [vmem:[#allocation2 + $0x48] sm:$0xff]  ;;  %v34_v8 = vld [vmem:[#allocation2 + $0x40] sm:$0xff] }
  0x10   :  { %137 = vmatprep.subr.mxu0 %v200_v0  ;;  %v33_v9 = vld [vmem:[#allocation2 + $0x38] sm:$0xff]  ;;  %v32_v10 = vld [vmem:[#allocation2 + $0x30] sm:$0xff]  ;;  %v31_v11 = vld [vmem:[#allocation2 + $0x28] sm:$0xff] }
  0x11   :  { %138 = vmatpush3.msra.mxu0 %v40_v2  ;;  %v30_v12 = vld [vmem:[#allocation2 + $0x20] sm:$0xff]  ;;  %v29_v13 = vld [vmem:[#allocation2 + $0x18] sm:$0xff]  ;;  %v28_v14 = vld [vmem:[#allocation2 + $0x10] sm:$0xff] }
  0x12   :  { %139 = vmatprep.subr.mxu0 %v200_v0  ;;  %v27_v15 = vld [vmem:[#allocation2 + $0x8] sm:$0xff]  ;;  %v26_v16 = vld [vmem:[#allocation2] sm:$0xff] }
  0x13   :  { %140 = vmatpush3.msra.mxu0 %v39_v3  ;;  %v25_v17 = vld [vmem:[%s226_s0] sm:$0xff] }
  0x14   :  { %141 = vmatprep.subr.mxu0 %v200_v0 }
  0x15   :  { %142 = vmatpush3.msra.mxu0 %v38_v4 }
  0x16   :  { %143 = vmatprep.subr.mxu0 %v200_v0 }
  0x17   :  { %144 = vmatpush3.msra.mxu0 %v37_v5 }
  0x18   :  { %145 = vmatprep.subr.mxu0 %v200_v0 }
  0x19   :  { %146 = vmatpush3.msra.mxu0 %v36_v6 }
  0x1a   :  { %147 = vmatprep.subr.mxu0 %v200_v0 }
  0x1b   :  { %148 = vmatpush3.msra.mxu0 %v35_v7 }
  0x1c   :  { %149 = vmatprep.subr.mxu0 %v200_v0 }
  0x1d   :  { %150 = vmatpush3.msra.mxu0 %v34_v8 }
  0x1e   :  { %151 = vmatprep.subr.mxu0 %v200_v0 }
  0x1f   :  { %152 = vmatpush3.msra.mxu0 %v33_v9 }
  0x20   :  { %153 = vmatprep.subr.mxu0 %v200_v0 }
  0x21   :  { %154 = vmatpush3.msra.mxu0 %v32_v10 }
  0x22   :  { %155 = vmatprep.subr.mxu0 %v200_v0 }
  0x23   :  { %156 = vmatpush3.msra.mxu0 %v31_v11 }
  0x24   :  { %157 = vmatprep.subr.mxu0 %v200_v0 }
  0x25   :  { %158 = vmatpush3.msra.mxu0 %v30_v12 }
  0x26   :  { %159 = vmatprep.subr.mxu0 %v200_v0 }
  0x27   :  { %160 = vmatpush3.msra.mxu0 %v29_v13 }
  0x28   :  { %161 = vmatprep.subr.mxu0 %v200_v0 }
  0x29   :  { %162 = vmatpush3.msra.mxu0 %v28_v14 }
  0x2a   :  { %163 = vmatprep.subr.mxu0 %v200_v0 }
  0x2b   :  { %164 = vmatpush3.msra.mxu0 %v27_v15 }
  0x2c   :  { %165 = vmatprep.subr.mxu0 %v200_v0 }
  0x2d   :  { %166 = vmatpush3.msra.mxu0 %v26_v16 }
  0x2e   :  { %168 = vmatmul.mubr.f32.vlgmr.msra.gmra.mxu0 %v25_v17 }
  0xee   :  { %v108_v18 = vpop.f32.mrf.mxu0 }
  0xef   :  { %112 = vst [vmem:[%s228_s2] sm:$0xff] %v108_v18 }
  0xf0   :  { %v169_v19 = vpop.f32.mrf.mxu0 }
  0xf1   :  { %117 = vsyncpa [#allocation3], 1 }

</bundles_post_ra>
